<compile_context>
chip_gen: v6e
topology: v6e:2x2x1
jax: 0.10.0
libtpu: 0.0.40
codegen_flags: <defaults>
</compile_context>

<pallas_src>
import jax
import jax.numpy as jnp
from jax.experimental import pallas as pl
from jax.experimental.pallas import tpu as pltpu


_DEFAULT_TILE_N = 65536                    # lanes per grid step (>=64K amortizes ~0.35us/step)
_DEFAULT_VMEM_LIMIT = 32 * 1024 * 1024     # safe on v5e/v6e/v7x; raise on v5e/v6e for 256K tiles


def _round_up(x, m):
    return ((x + m - 1) // m) * m


def _alpha_list(alpha, num_classes):
    """Mirror focal_loss.__init__ parameter handling."""
    if isinstance(alpha, (list, tuple)):
        assert len(alpha) == num_classes
        return [float(v) for v in alpha]
    assert alpha < 1
    return [float(alpha)] + [1.0 - float(alpha)] * (num_classes - 1)


def _pick_tile(n, tile_n):
    """Choose the lane-tile size:
      * <= requested tile_n and <= the (128-rounded) problem size,
      * small enough that the parallel grid has >= 2 steps when N allows it
        (keeps both v7x TensorCores busy; irrelevant on single-TC v5e/v6e),
      * a power-of-two multiple of 128 so the in-kernel pairwise lane folding
        only uses 128-aligned static slices.
    """
    n_lanes = _round_up(max(int(n), 1), 128)
    t = max(128, min(int(tile_n), n_lanes))
    if n_lanes >= 256:
        t = min(t, _round_up(pl.cdiv(n_lanes, 2), 128))
    t = 128 * (1 << max((t // 128).bit_length() - 1, 0))
    return t


def _focal_tail(p, lp, lab, alpha_list, gamma, n_true, tile_n, out_ref):
    """Common epilogue: alpha select, (1-p)^gamma, ragged-tail mask, per-lane partial."""
    two_valued = len(alpha_list) > 1 and len(set(alpha_list[1:])) == 1
    if two_valued:
        # scalar-alpha case: classes 1..C-1 share (1 - alpha) -> single select
        a = jnp.where(lab == 0, jnp.float32(alpha_list[0]), jnp.float32(alpha_list[1]))
    else:
        a = jnp.full(lab.shape, alpha_list[0], jnp.float32)
        for ci in range(1, len(alpha_list)):
            a = jnp.where(lab == ci, jnp.float32(alpha_list[ci]), a)
    a = a.astype(jnp.float32)

    d = jnp.maximum(1.0 - p, 0.0)
    g = float(gamma)
    if g.is_integer() and g >= 0.0:
        e = int(g)
        pow_term = jnp.ones_like(d)
        base = d
        while e > 0:                     # exponentiation by squaring, pure VPU
            if e & 1:
                pow_term = pow_term * base
            e >>= 1
            if e:
                base = base * base
    else:
        # d ** gamma via exp/log on the EUP; d == 0 -> 0, like torch.pow
        safe = jnp.maximum(d, jnp.float32(1e-30))
        pow_term = jnp.where(d > 0.0, jnp.exp(g * jnp.log(safe)), 0.0)

    loss = -(a * pow_term * lp)                                   # (1, tile_n)

    # mask the ragged last block (no wrapper-side padding anymore)
    col = (jax.lax.broadcasted_iota(jnp.int32, loss.shape, 1)
           + pl.program_id(0) * tile_n)
    loss = jnp.where(col < n_true, loss, 0.0)

    # pairwise fold to a lane-dense (1, 128) partial: only 128-aligned static
    # slices + VPU adds (no cross-lane XLU reduce, no scalar broadcast), and a
    # tree-shaped sum improves f32 accuracy at 64K+ tiles.
    acc = loss
    w = tile_n
    while w > 128:
        w //= 2
        acc = acc[:, :w] + acc[:, w:]
    out_ref[...] = acc.reshape(1, 1, 128)


def _make_gather_kernel(alpha_list, gamma, n_true, tile_n):
    """preds_softmax / preds_logsoft given as (C, tile_n) class-major blocks."""
    def kernel(ps_ref, plog_ref, lab_ref, out_ref):
        ps = ps_ref[...].astype(jnp.float32)       # (C, T) softmax probs
        plog = plog_ref[...].astype(jnp.float32)   # (C, T) log-softmax
        lab = lab_ref[...]                         # (1, T) int32 labels
        c, tn = ps.shape
        class_ids = jax.lax.broadcasted_iota(jnp.int32, (c, tn), 0)
        onehot = (class_ids == lab).astype(jnp.float32)
        # gather(1, labels) as a one-hot masked reduce over the C sublanes
        p = jnp.sum(ps * onehot, axis=0, keepdims=True)          # (1, T)
        lp = jnp.sum(plog * onehot, axis=0, keepdims=True)       # (1, T)
        _focal_tail(p, lp, lab, alpha_list, gamma, n_true, tile_n, out_ref)
    return kernel


def _make_logits_kernel(alpha_list, gamma, n_true, tile_n):
    """Single (C, tile_n) logits block; softmax + log-softmax computed in-kernel."""
    def kernel(lg_ref, lab_ref, out_ref):
        lg = lg_ref[...].astype(jnp.float32)       # (C, T) logits
        lab = lab_ref[...]                         # (1, T)
        c, tn = lg.shape
        m = jnp.max(lg, axis=0, keepdims=True)     # (1, T) sublane max (XLU)
        e = jnp.exp(lg - m)                        # (C, T) EUP
        s = jnp.sum(e, axis=0, keepdims=True)      # (1, T)
        class_ids = jax.lax.broadcasted_iota(jnp.int32, (c, tn), 0)
        onehot = (class_ids == lab).astype(jnp.float32)
        x_lab = jnp.sum(lg * onehot, axis=0, keepdims=True)      # gathered logit
        e_lab = jnp.sum(e * onehot, axis=0, keepdims=True)
        p = e_lab / s                                             # softmax[label]
        lp = (x_lab - m) - jnp.log(s)                             # log_softmax[label]
        _focal_tail(p, lp, lab, alpha_list, gamma, n_true, tile_n, out_ref)
    return kernel


def _run_focal(kernel, big_inputs, labels2d, n, num_classes, tile_n, grid_g,
               vmem_limit_bytes, trans_per_elem, in_dtype_bytes):
    cost = pl.CostEstimate(
        flops=(8 * num_classes + 16) * grid_g * tile_n,
        transcendentals=trans_per_elem * grid_g * tile_n,
        bytes_accessed=(len(big_inputs) * num_classes * n * in_dtype_bytes
                        + n * 4 + grid_g * 128 * 4),
    )
    in_specs = ([pl.BlockSpec((num_classes, tile_n), lambda i: (0, i))
                 for _ in big_inputs]
                + [pl.BlockSpec((1, tile_n), lambda i: (0, i))])
    partials = pl.pallas_call(
        kernel,
        out_shape=jax.ShapeDtypeStruct((grid_g, 1, 128), jnp.float32),
        grid=(grid_g,),
        in_specs=in_specs,
        out_specs=pl.BlockSpec((1, 1, 128), lambda i: (i, 0, 0)),
        compiler_params=pltpu.CompilerParams(
            dimension_semantics=("parallel",),
            vmem_limit_bytes=int(vmem_limit_bytes)),
        cost_estimate=cost,
    )(*big_inputs, labels2d)
    return jnp.sum(partials)


def focal_loss_pallas(preds_softmax, preds_logsoft, labels, alpha=0.25, gamma=2.0,
                      num_classes=5, size_average=True, *, class_major=False,
                      tile_n=_DEFAULT_TILE_N, vmem_limit_bytes=_DEFAULT_VMEM_LIMIT):
    """JAX/Pallas equivalent of focal_loss.forward.

    preds_softmax / preds_logsoft: (N, C) arrays (class_major=False, module layout)
    or (C, N) arrays (class_major=True, recommended: avoids a materialized
    transpose pass over HBM).  labels: (N,) ints in [0, num_classes).
    Returns a scalar float32 loss (mean if size_average else sum).
    """
    if class_major:
        ps_cm, plog_cm = preds_softmax, preds_logsoft
        c, n = ps_cm.shape
    else:
        n, c = preds_softmax.shape
        # NOTE: this materializes one extra HBM pass per array; prefer producing
        # class-major (C, N) upstream (class_major=True), or use
        # focal_loss_from_logits_pallas for the bandwidth-optimal path.
        ps_cm, plog_cm = preds_softmax.T, preds_logsoft.T
    assert c == num_classes

    alphas = _alpha_list(alpha, num_classes)
    t = _pick_tile(n, tile_n)
    g = pl.cdiv(n, t)
    lab2 = labels.astype(jnp.int32).reshape(1, -1)

    kernel = _make_gather_kernel(alphas, gamma, n, t)
    trans = 0 if float(gamma).is_integer() else 2
    total = _run_focal(kernel, (ps_cm, plog_cm), lab2, n, num_classes, t, g,
                       vmem_limit_bytes, trans, jnp.dtype(ps_cm.dtype).itemsize)
    return total / jnp.float32(n) if size_average else total


def focal_loss_from_logits_pallas(logits, labels, alpha=0.25, gamma=2.0,
                                  num_classes=5, size_average=True, *,
                                  class_major=False, tile_n=_DEFAULT_TILE_N,
                                  vmem_limit_bytes=_DEFAULT_VMEM_LIMIT):
    """Bandwidth-optimal variant: takes raw logits (ideally class-major (C, N)) and
    computes softmax + log-softmax in-kernel -> one big HBM input instead of two."""
    if class_major:
        lg_cm = logits
        c, n = lg_cm.shape
    else:
        n, c = logits.shape
        lg_cm = logits.T
    assert c == num_classes

    alphas = _alpha_list(alpha, num_classes)
    t = _pick_tile(n, tile_n)
    g = pl.cdiv(n, t)
    lab2 = labels.astype(jnp.int32).reshape(1, -1)

    kernel = _make_logits_kernel(alphas, gamma, n, t)
    trans = (num_classes + 2) if float(gamma).is_integer() else (num_classes + 4)
    total = _run_focal(kernel, (lg_cm,), lab2, n, num_classes, t, g,
                       vmem_limit_bytes, trans, jnp.dtype(lg_cm.dtype).itemsize)
    return total / jnp.float32(n) if size_average else total


def focal_loss_reference(preds_softmax, preds_logsoft, labels, alpha=0.25, gamma=2.0,
                         num_classes=5, size_average=True):
    """Pure-JAX reference mirroring the PyTorch semantics."""
    if isinstance(alpha, (list, tuple)):
        alpha_vec = jnp.array(alpha, dtype=jnp.float32)
    else:
        alpha_vec = jnp.concatenate(
            [jnp.array([alpha], dtype=jnp.float32),
             jnp.full((num_classes - 1,), 1.0 - alpha, dtype=jnp.float32)])
    p = jnp.take_along_axis(preds_softmax.astype(jnp.float32), labels[:, None], axis=1)
    lp = jnp.take_along_axis(preds_logsoft.astype(jnp.float32), labels[:, None], axis=1)
    a = alpha_vec[labels]
    loss = -jnp.power(1.0 - p, gamma) * lp
    loss = a * loss.T
    return jnp.mean(loss) if size_average else jnp.sum(loss)


if __name__ == "__main__":
    key = jax.random.PRNGKey(0)
    k_logits, k_labels = jax.random.split(key)

    N, C = 300, 5      # small, but exercises a 2-step parallel grid + ragged-tail masking
    logits = jax.random.normal(k_logits, (N, C), dtype=jnp.float32)
    labels = jax.random.randint(k_labels, (N,), 0, C, dtype=jnp.int32)
    preds_softmax = jax.nn.softmax(logits, axis=-1)
    preds_logsoft = jax.nn.log_softmax(logits, axis=-1)

    # 1) module-identical interface: (N, C) softmax / log-softmax inputs, mean reduction
    out = jax.block_until_ready(
        focal_loss_pallas(preds_softmax, preds_logsoft, labels,
                          alpha=0.25, gamma=2.0, num_classes=C, size_average=True))
    ref = focal_loss_reference(preds_softmax, preds_logsoft, labels,
                               alpha=0.25, gamma=2.0, num_classes=C, size_average=True)
    assert jnp.allclose(out, ref, atol=1e-6, rtol=1e-5), (out, ref)

    # 2) class-major producer (no standalone transposes in the loss path),
    #    per-class alpha list, sum reduction
    alpha_list = [0.1, 0.3, 0.2, 0.25, 0.15]
    ps_cm = jax.nn.softmax(logits.T, axis=0)          # producer emits (C, N) directly
    plog_cm = jax.nn.log_softmax(logits.T, axis=0)
    out_sum = jax.block_until_ready(
        focal_loss_pallas(ps_cm, plog_cm, labels, alpha=alpha_list, gamma=2.0,
                          num_classes=C, size_average=False, class_major=True))
    ref_sum = focal_loss_reference(preds_softmax, preds_logsoft, labels,
                                   alpha=alpha_list, gamma=2.0, num_classes=C,
                                   size_average=False)
    assert jnp.allclose(out_sum, ref_sum, atol=1e-5, rtol=1e-5), (out_sum, ref_sum)

    # 3) logits-only kernel (softmax + log-softmax computed in-kernel), non-integer gamma
    out_lg = jax.block_until_ready(
        focal_loss_from_logits_pallas(logits.T, labels, alpha=0.25, gamma=1.5,
                                      num_classes=C, size_average=True,
                                      class_major=True))
    ref_lg = focal_loss_reference(preds_softmax, preds_logsoft, labels,
                                  alpha=0.25, gamma=1.5, num_classes=C,
                                  size_average=True)
    assert jnp.allclose(out_lg, ref_lg, atol=1e-5, rtol=1e-4), (out_lg, ref_lg)

    print("KERNEL_OK")
</pallas_src>

<mosaic_0001>
module attributes {stable_mosaic.version = 11 : i64} {
  func.func @kernel(%arg0: i32, %arg1: memref<5x256xf32, #tpu.memory_space<vmem>>, %arg2: memref<5x256xf32, #tpu.memory_space<vmem>>, %arg3: memref<1x256xi32, #tpu.memory_space<vmem>>, %arg4: memref<1x1x128xf32, #tpu.memory_space<vmem>>) attributes {dimension_semantics = [#tpu.dimension_semantics<parallel>], iteration_bounds = array<i64: 2>, scalar_prefetch = 0 : i64, scratch_operands = 0 : i64, tpu.core_type = #tpu.core_type<tc>, window_params = [{transform_indices = @transform_0, window_bounds = array<i64: 5, 256>}, {transform_indices = @transform_1, window_bounds = array<i64: 5, 256>}, {transform_indices = @transform_2, window_bounds = array<i64: 1, 256>}, {transform_indices = @transform_3, window_bounds = array<i64: 1, 1, 128>}]} {
    %c0 = arith.constant 0 : index
    %c0_0 = arith.constant 0 : index
    %0 = vector.load %arg1[%c0, %c0_0] : memref<5x256xf32, #tpu.memory_space<vmem>>, vector<5x256xf32>
    %c0_1 = arith.constant 0 : index
    %c0_2 = arith.constant 0 : index
    %1 = vector.load %arg2[%c0_1, %c0_2] : memref<5x256xf32, #tpu.memory_space<vmem>>, vector<5x256xf32>
    %c0_3 = arith.constant 0 : index
    %c0_4 = arith.constant 0 : index
    %2 = vector.load %arg3[%c0_3, %c0_4] : memref<1x256xi32, #tpu.memory_space<vmem>>, vector<1x256xi32>
    %3 = tpu.iota {dimensions = array<i32: 0>} : vector<5x256xi32>
    %4 = vector.broadcast %2 : vector<1x256xi32> to vector<5x256xi32>
    %5 = arith.cmpi eq, %3, %4 : vector<5x256xi32>
    %6 = arith.extui %5 : vector<5x256xi1> to vector<5x256xi32>
    %7 = arith.sitofp %6 : vector<5x256xi32> to vector<5x256xf32>
    %8 = arith.mulf %0, %7 : vector<5x256xf32>
    %cst = arith.constant dense<0.000000e+00> : vector<256xf32>
    %9 = vector.multi_reduction <add>, %8, %cst [0] : vector<5x256xf32> to vector<256xf32>
    %10 = vector.shape_cast %9 : vector<256xf32> to vector<1x256xf32>
    %11 = arith.mulf %1, %7 : vector<5x256xf32>
    %cst_5 = arith.constant dense<0.000000e+00> : vector<256xf32>
    %12 = vector.multi_reduction <add>, %11, %cst_5 [0] : vector<5x256xf32> to vector<256xf32>
    %13 = vector.shape_cast %12 : vector<256xf32> to vector<1x256xf32>
    %c0_i32 = arith.constant 0 : i32
    %14 = vector.broadcast %c0_i32 : i32 to vector<1x256xi32>
    %15 = arith.cmpi eq, %2, %14 : vector<1x256xi32>
    %cst_6 = arith.constant 2.500000e-01 : f32
    %cst_7 = arith.constant 7.500000e-01 : f32
    %16 = vector.broadcast %cst_6 : f32 to vector<1x256xf32>
    %17 = vector.broadcast %cst_7 : f32 to vector<1x256xf32>
    %18 = arith.select %15, %16, %17 : vector<1x256xi1>, vector<1x256xf32>
    %cst_8 = arith.constant 1.000000e+00 : f32
    %19 = vector.broadcast %cst_8 : f32 to vector<1x256xf32>
    %20 = arith.subf %19, %10 : vector<1x256xf32>
    %cst_9 = arith.constant 0.000000e+00 : f32
    %21 = vector.broadcast %cst_9 : f32 to vector<1x256xf32>
    %22 = arith.maximumf %20, %21 : vector<1x256xf32>
    %cst_10 = arith.constant 1.000000e+00 : f32
    %23 = vector.broadcast %cst_10 : f32 to vector<1x256xf32>
    %24 = arith.mulf %22, %22 : vector<1x256xf32>
    %25 = arith.mulf %23, %24 : vector<1x256xf32>
    %26 = arith.mulf %18, %25 : vector<1x256xf32>
    %27 = arith.mulf %26, %13 : vector<1x256xf32>
    %cst_11 = arith.constant 0.000000e+00 : f32
    %28 = vector.broadcast %cst_11 : f32 to vector<1x256xf32>
    %29 = arith.subf %28, %27 : vector<1x256xf32>
    %30 = tpu.iota {dimensions = array<i32: 1>} : vector<1x256xi32>
    %c256_i32 = arith.constant 256 : i32
    %31 = arith.muli %arg0, %c256_i32 : i32
    %32 = vector.broadcast %31 : i32 to vector<1x256xi32>
    %33 = arith.addi %30, %32 : vector<1x256xi32>
    %c300_i32 = arith.constant 300 : i32
    %34 = vector.broadcast %c300_i32 : i32 to vector<1x256xi32>
    %35 = arith.cmpi slt, %33, %34 : vector<1x256xi32>
    %cst_12 = arith.constant 0.000000e+00 : f32
    %36 = vector.broadcast %cst_12 : f32 to vector<1x256xf32>
    %37 = arith.select %35, %29, %36 : vector<1x256xi1>, vector<1x256xf32>
    %38 = vector.extract_strided_slice %37 {offsets = [0, 0], sizes = [1, 128], strides = [1, 1]} : vector<1x256xf32> to vector<1x128xf32>
    %39 = vector.extract_strided_slice %37 {offsets = [0, 128], sizes = [1, 128], strides = [1, 1]} : vector<1x256xf32> to vector<1x128xf32>
    %40 = arith.addf %38, %39 : vector<1x128xf32>
    %41 = vector.shape_cast %40 : vector<1x128xf32> to vector<1x1x128xf32>
    %c0_13 = arith.constant 0 : index
    %c0_14 = arith.constant 0 : index
    %c0_15 = arith.constant 0 : index
    %42 = vector.load %arg4[%c0_13, %c0_14, %c0_15] : memref<1x1x128xf32, #tpu.memory_space<vmem>>, vector<1x1x128xf32>
    tpu.vector_store %arg4[%c0_13, %c0_14, %c0_15], %41 {strides = array<i32>} : memref<1x1x128xf32, #tpu.memory_space<vmem>>, vector<1x1x128xf32>,
    return
  }
  func.func @transform_0(%arg0: i32) -> (i32, i32) {
    %c0_i32 = arith.constant 0 : i32
    %c0_i32_0 = arith.constant 0 : i32
    return %c0_i32, %arg0 : i32, i32
  }
  func.func @transform_1(%arg0: i32) -> (i32, i32) {
    %c0_i32 = arith.constant 0 : i32
    %c0_i32_0 = arith.constant 0 : i32
    return %c0_i32, %arg0 : i32, i32
  }
  func.func @transform_2(%arg0: i32) -> (i32, i32) {
    %c0_i32 = arith.constant 0 : i32
    %c0_i32_0 = arith.constant 0 : i32
    return %c0_i32, %arg0 : i32, i32
  }
  func.func @transform_3(%arg0: i32) -> (i32, i32, i32) {
    %c0_i32 = arith.constant 0 : i32
    %c0_i32_0 = arith.constant 0 : i32
    %c0_i32_1 = arith.constant 0 : i32
    return %arg0, %c0_i32, %c0_i32_0 : i32, i32, i32
  }
}

</mosaic_0001>

<bundles_post_ra>
// kernel: tpu_custom_call.1
= control target key start
LH: loop header
LB: loop body
LE: loop exit
PB: predicated region body
PF: predicated region fallthrough
CT: control target
= control target key end

     0   :  { %8 = vsyncpa [#allocation3], 0  ;;  %s942_s0 = inlined_call_operand.hbm [shape: f32[5,300], index: 0, kind: input, shape index: {}]   ;;  %s943_s1 = inlined_call_operand.hbm [shape: f32[5,300], index: 1, kind: input, shape index: {}]   ;;  %s944_s2 = inlined_call_operand.vmem [shape: s32[1,300], index: 2, kind: input, shape index: {}]   ;;  %s945_s3 = inlined_call_operand.hbm [shape: f32[2,1,128], index: 3, kind: output, shape index: {}]  }
   0x1   :  { %10 = vsyncpa [#allocation3 + $0x1], 0 }
   0x2   :  { %11 = vsyncpa [#allocation6], 0 }
   0x3   :  { %13 = vsyncpa [#allocation6 + $0x1], 0 }
   0x4   :  { %14 = vsyncpa [#allocation4], 0 }
   0x5   :  { %16 = vsyncpa [#allocation4 + $0x1], 0  ;;  %s742_s12 = smov 0   ;;  %s744_s13 = smov 0  }
   0x6   :  { %s746_s14 = smov 0   ;;  %s748_s15 = smov 0  }
   0x7 LB: > { %s763_s16 = sadd.s32 4294967295, %s714_s15   ;;  %s521_s17 = sadd.s32 4294967294, %s714_s15   ;;  %s714_s15 = sphi %s748_s15, %s960_s15   ;;  %s710_s14 = sphi %s746_s14, %s959_s14   ;;  %s706_s13 = sphi %s744_s13, %s958_s13   ;;  %s702_s12 = sphi %s742_s12, %s957_s12  }
   0x8   : > { %s767_s18 = sadd.s32 1, %s714_s15   ;;  %s29_s19 = sadd.s32 1, %s710_s14 }
   0x9   : > { %s26_s20 = ssub.s32 %s714_s15, %s767_s18  ;;  %p36_p0 = scmp.ne.s32.totalorder %s710_s14, %s706_s13 }
   0xa   : > { %p27_p1 = scmp.eq.s32.totalorder %s26_s20, 0  ;;  %p37_p2 = scmp.eq.s32.totalorder %s714_s15, 0 }
   0xb   : > { %p42_p3 = scmp.ne.s32.totalorder %s706_s13, %s702_s12  ;;  %p43_p4 = scmp.eq.s32.totalorder %s763_s16, 0 }
   0xc   : > { %s779_s21 = scalar_select %p27_p1, %s710_s14, %s29_s19  }
   0xd   : > { %p781_p5 = por %p37_p2, %p36_p0  ;;  %p785_p6 = por %p43_p4, %p42_p3 }
   0xe   : > { %p118_p7 = scmp.eq.s32.totalorder %s763_s16, 1  ;;  %p124_p8 = scmp.eq.s32.totalorder %s521_s17, 1 }
   0xf   : > { %s950_s23 = scalar_select %p785_p6, 1, 0 }
  0x10   : > { %p790_p9 = por %p118_p7, %p36_p0  ;;  %p794_p10 = por %p124_p8, %p42_p3 }
  0x11   : > { %p946_p11 = scmp.ge.s32.totalorder %s714_s15, 2 }
  0x12   : > { %s951_s24 = scalar_select %p790_p9, 1, 0 }
  0x13   : > { %s952_s25 = scalar_select %p794_p10, 1, 0 }
  0x14   : > { %140 = sbr.rel (%p946_p11) target bundleno = 87 (0x57), region = 16 }
  0x19   : > { %143 = sbr.rel (!%p781_p5) target bundleno = 56 (0x38), region = 20  ;;  %s144_s26 = sand.u32 (%p781_p5), 1, %s710_s14  }
  0x1a   : > { %s525_s27 = sshll.u32 (%p781_p5), %s714_s15, 1  ;;  %s524_s28 = sshll.u32 (%p781_p5), %s144_s26, 4 }
  0x1b   : > { %s150_s29 = ssub.s32 (%p781_p5), 3, %s525_s27  ;;  %s808_s5 = scalar_lea.sflag (%p781_p5), [#allocation3], %s144_s26 }
  0x1c   : > { %p151_p12 = scmp.lt.s32.totalorder (%p781_p5), %s150_s29, 2  ;;  %s148_s6 = scalar_lea.vmem (%p781_p5), [#allocation2], %s524_s28 }
  0x1e   : > { %s962_s29 = smov (!%p151_p12, %s150_s29), 2 }
  0x1f   : > { %s805_s30 = sshll.u32 %s962_s29, 7 }
  0x20   : > { %s155_s4 = ssub.s32 256, %s805_s30 }
  0x21   : > { %156 = vsyncadd %s808_s5, %s155_s4  ;;  %p527_p13 = scmp.ne.s32.totalorder %s805_s30, 0  ;;  %s548_s7 = sshll.u32 %s714_s15, 8 }
  0x22   : > { %s159_s10 = scalar_lea.hbm %s942_s0, %s548_s7  ;;  %s162_s11 = sshll.u32 %s148_s6, 4  ;;  %s163_s11 = int_to_ptr.vmem [resolvable:$true] %s162_s11 }
  0x23   : > { %s594_s17 = scalar_lea.hbm %s159_s10, %s805_s30  ;;  %s598_s26 = scalar_lea.hbm %s942_s0, 384 }
  0x24   : > { %p595_p0 = scmp.ne.s32.totalorder %s159_s10, %s594_s17  ;;  %p599_p3 = scmp.lt.s32.totalorder %s159_s10, %s942_s0 }
  0x25   : > { %p600_p4 = scmp.lt.s32.totalorder %s598_s26, %s594_s17 }
  0x26   : > { %p596_p1 = pnand %p595_p0, %p527_p13 }
  0x27   : > { %p601_p7 = por %p600_p4, %p599_p3 }
  0x28   : > { %p597_p2 = pneg %p596_p1 }
  0x2a   : > { %p602_p8 = pnand %p601_p7, %p597_p2 }
  0x2c   : > { %605 = shalt.err (!%p602_p8)
}
  0x2d   : > { %s606_s29 = scalar_lea.vmem %s163_s11, %s805_s30  ;;  %s716_s4 = smov [#allocation2]  }
  0x2e   : > { %p607_p12 = scmp.ne.s32.totalorder %s163_s11, %s606_s29  ;;  %s610_s6 = sshll.u32 %s716_s4, 4  ;;  %s611_s6 = int_to_ptr.vmem [resolvable:$false] %s610_s6 }
  0x2f   : > { %s612_s7 = scalar_lea.vmem %s611_s6, 512  ;;  %p613_p1 = scmp.lt.s32.totalorder %s163_s11, %s611_s6 }
  0x30   : > { %p608_p11 = pnand %p607_p12, %p527_p13  ;;  %p614_p10 = scmp.lt.s32.totalorder %s612_s7, %s606_s29 }
  0x32   : > { %p609_p0 = pneg %p608_p11  ;;  %p615_p9 = por %p614_p10, %p613_p1 }
  0x34   : > { %p616_p6 = pnand %p615_p9, %p609_p0 }
  0x36   : > { %619 = shalt.err (!%p616_p6)
}
  0x37   : > { %165 = dma.hbm_to_vmem [thread:$0]  (%p527_p13), %s159_s10, %s805_s30, %s163_s11, %s808_s5  }
  0x38 PF: > { %168 = sbr.rel (!%p781_p5) target bundleno = 87 (0x57), region = 24  ;;  %s169_s8 = sand.u32 (%p781_p5), 1, %s710_s14  }
  0x39   : > { %s532_s9 = sshll.u32 (%p781_p5), %s714_s15, 1  ;;  %s531_s17 = sshll.u32 (%p781_p5), %s169_s8, 4 }
  0x3a   : > { %s175_s19 = ssub.s32 (%p781_p5), 3, %s532_s9  ;;  %s839_s27 = scalar_lea.sflag (%p781_p5), [#allocation6], %s169_s8 }
  0x3b   : > { %p176_p11 = scmp.lt.s32.totalorder (%p781_p5), %s175_s19, 2  ;;  %s173_s30 = scalar_lea.vmem (%p781_p5), [#allocation5], %s531_s17 }
  0x3d   : > { %s964_s19 = smov (!%p176_p11, %s175_s19), 2 }
  0x3e   : > { %s836_s20 = sshll.u32 %s964_s19, 7 }
  0x3f   : > { %s180_s26 = ssub.s32 256, %s836_s20 }
  0x40   : > { %181 = vsyncadd %s839_s27, %s180_s26  ;;  %p534_p5 = scmp.ne.s32.totalorder %s836_s20, 0  ;;  %s549_s22 = sshll.u32 %s714_s15, 8 }
  0x41   : > { %s184_s11 = scalar_lea.hbm %s943_s1, %s549_s22  ;;  %s187_s28 = sshll.u32 %s173_s30, 4  ;;  %s188_s28 = int_to_ptr.vmem [resolvable:$true] %s187_s28 }
  0x42   : > { %s620_s29 = scalar_lea.hbm %s184_s11, %s836_s20  ;;  %s624_s7 = scalar_lea.hbm %s943_s1, 384 }
  0x43   : > { %p621_p6 = scmp.ne.s32.totalorder %s184_s11, %s620_s29  ;;  %p625_p13 = scmp.lt.s32.totalorder %s184_s11, %s943_s1 }
  0x44   : > { %p626_p2 = scmp.lt.s32.totalorder %s624_s7, %s620_s29 }
  0x45   : > { %p622_p9 = pnand %p621_p6, %p534_p5 }
  0x46   : > { %p627_p3 = por %p626_p2, %p625_p13 }
  0x47   : > { %p623_p10 = pneg %p622_p9 }
  0x49   : > { %p628_p4 = pnand %p627_p3, %p623_p10 }
  0x4b   : > { %631 = shalt.err (!%p628_p4)
}
  0x4c   : > { %s632_s17 = scalar_lea.vmem %s188_s28, %s836_s20  ;;  %s717_s19 = smov [#allocation5]  }
  0x4d   : > { %p633_p7 = scmp.ne.s32.totalorder %s188_s28, %s632_s17  ;;  %s636_s26 = sshll.u32 %s717_s19, 4  ;;  %s637_s26 = int_to_ptr.vmem [resolvable:$false] %s636_s26 }
  0x4e   : > { %s638_s30 = scalar_lea.vmem %s637_s26, 512  ;;  %p639_p0 = scmp.lt.s32.totalorder %s188_s28, %s637_s26 }
  0x4f   : > { %p634_p8 = pnand %p633_p7, %p534_p5  ;;  %p640_p1 = scmp.lt.s32.totalorder %s638_s30, %s632_s17 }
  0x51   : > { %p635_p12 = pneg %p634_p8  ;;  %p641_p11 = por %p640_p1, %p639_p0 }
  0x53   : > { %p642_p6 = pnand %p641_p11, %p635_p12 }
  0x55   : > { %645 = shalt.err (!%p642_p6)
}
  0x56   : > { %190 = dma.hbm_to_vmem [thread:$0]  (%p534_p5), %s184_s11, %s836_s20, %s188_s28, %s839_s27  }
  0x57 PF: > { %p538_p9 = scmp.ge.s32.totalorder %s714_s15, 1  ;;  %p208_p10 = scmp.lt.s32.totalorder %s714_s15, 3 }
  0x59   : > { %p209_p13 = pnand %p538_p9, %p208_p10 }
  0x5a   : > { %s866_s22 = sand.u32 (!%p209_p13), 1, %s706_s13   ;;  %p953_p2 = scmp.ne.s32.totalorder (!%p209_p13), %s950_s23, 0 }
  0x5b   : > { %212 = sbr.rel (%p209_p13) target bundleno = 160 (0xa0), region = 32  ;;  %s539_s5 = sshll.u32 (!%p209_p13), %s866_s22, 4 }
  0x5c   : > { %s215_s10 = scalar_lea.sflag (!%p209_p13), [#allocation3], %s866_s22  ;;  %s218_s29 = scalar_lea.vmem (!%p209_p13), [#allocation2], %s539_s5 }
  0x60   : > { %689 = dma.done.wait (%p953_p2), %s215_s10, 256  }
  0x61   : > { %691 = vsyncadd (%p953_p2), %s215_s10, 4294967040  ;;  %s224_s20 = scalar_lea.sflag [#allocation6], %s866_s22  ;;  %s227_s27 = scalar_lea.vmem [#allocation5], %s539_s5 }
  0x62   : > { %693 = dma.done.wait (%p953_p2), %s224_s20, 256  }
  0x63   : > { %695 = vsyncadd (%p953_p2), %s224_s20, 4294967040  ;;  %s541_s11 = sshll.u32 %s763_s16, 1  ;;  %v290_v0 = vlaneseq  ;;  %v285_v5 = vld [vmem:[%s218_s29] sm:$0x1f]  ;;  %v286_v8 = vld [vmem:[%s218_s29 + $0x8] sm:$0x1f] }
  0x64   : > { %p277_p5 = scmp.lt.s32.totalorder %s541_s11, 2  ;;  %v287_v9 = vld [vmem:[%s227_s27] sm:$0x1f]  ;;  %v288_v10 = vld [vmem:[%s227_s27 + $0x8] sm:$0x1f]  ;;  %v718_v11 = vmov 0.0  }
  0x65   : > { %v881_v1 = vshrl.u32 %v290_v0, 7  ;;  %vm308_vm2 = vcmask 1044480   ;;  %v719_v38 = vmov 1966171168   ;;  %v387_v57 = vand.u32 127, %v290_v0  ;;  %s544_s23 = sshll.u32 %s763_s16, 8 }
  0x66   : > { %s966_s11 = smov (!%p277_p5, %s541_s11), 2  ;;  %v351_v39 = vunpack.c.l.s4 %v719_v38  ;;  %v720_v61 = vmov 0.75   ;;  %s261_s7 = scalar_lea.vmem [#allocation7], %s866_s22 }
  0x67   : > { %s279_s6 = scalar_lea.vmem %s944_s2, %s966_s11  ;;  %v294_v2 = vsub.s32 0, %v881_v1  ;;  %v298_v3 = vsub.s32 1, %v881_v1  ;;  %v388_v63 = vadd.s32 128, %v387_v57  ;;  %s423_s8 = sshll.u32 %s261_s7, 4  ;;  %s424_s8 = int_to_ptr.vmem [resolvable:$true] %s423_s8 }
  0x68   : > { %v888_v4 = vld [vmem:[%s279_s6] sm:$0x3]  ;;  %v352_v50 = vunpack.c.0.s8 %v351_v39  ;;  %s545_s9 = sshll.u32 %s763_s16, 4  ;;  %s411_s30 = scalar_lea.sflag [#allocation4], %s866_s22 }
  0x69   : > { %v295_v6 = vrot.slane %v888_v4, %v294_v2  ;;  %v299_v7 = vrot.slane %v888_v4, %v298_v3  ;;  %vm339_vm3 = vcmp.eq.s32.totalorder %v888_v4, 0  ;;  %s421_s26 = scalar_lea.hbm %s945_s3, %s545_s9  ;;  %s646_s5 = scalar_lea.vmem %s424_s8, 16 }
  0x6a   : > { %v355_v56 = vsub.s32 %v352_v50, %v881_v1  ;;  %v340_v62 = vsel %vm339_vm3, 0.25, %v720_v61  ;;  %p647_p3 = scmp.ne.s32.totalorder %s424_s8, %s646_s5  ;;  %p954_p4 = scmp.ne.s32.totalorder %s951_s24, 0 }
  0x6b   : > { %vm300_vm0 = vcmp.eq.s32.totalorder %v881_v1, %v295_v6  ;;  %vm301_vm1 = vcmp.eq.s32.totalorder %v881_v1, %v299_v7  ;;  %v390_v7 = vstv %s544_s23  ;;  %s721_s10 = smov [#allocation7]  }
  0x6c   : > { %v542_v12 = vsel %vm300_vm0, 1.0, %v718_v11  ;;  %v543_v13 = vsel %vm301_vm1, 1.0, %v718_v11  ;;  %p648_p7 = pnand %p647_p3, %p954_p4  ;;  %s650_s29 = sshll.u32 %s721_s10, 4  ;;  %s651_s29 = int_to_ptr.vmem [resolvable:$false] %s650_s29 }
  0x6d   : > { %v306_v14 = vmul.f32 %v542_v12, %v285_v5  ;;  %v307_v15 = vmul.f32 %v543_v13, %v286_v8  ;;  %v323_v16 = vmul.f32 %v542_v12, %v287_v9  ;;  %v324_v17 = vmul.f32 %v543_v13, %v288_v10  ;;  %s652_s20 = scalar_lea.vmem %s651_s29, 32  ;;  %p653_p12 = scmp.lt.s32.totalorder %s424_s8, %s651_s29 }
  0x6e   : > { %v391_v9 = vadd.s32 %v390_v7, %v387_v57  ;;  %v392_v10 = vadd.s32 %v390_v7, %v388_v63  ;;  %p649_p8 = pneg %p648_p7  ;;  %p654_p0 = scmp.lt.s32.totalorder %s652_s20, %s646_s5 }
  0x6f   : > { %v309_v18 = vsel %vm308_vm2, %v306_v14, 0.0  ;;  %v316_v19 = vsel %vm308_vm2, %v307_v15, 0.0  ;;  %v325_v20 = vsel %vm308_vm2, %v323_v16, 0.0  ;;  %v332_v21 = vsel %vm308_vm2, %v324_v17, 0.0 }
  0x70   : > { %v310_v22 = vrot.slane %v309_v18, 4  ;;  %v317_v23 = vrot.slane %v316_v19, 4  ;;  %v326_v24 = vrot.slane %v325_v20, 4  ;;  %v333_v25 = vrot.slane %v332_v21, 4  ;;  %p655_p1 = por %p654_p0, %p653_p12 }
  0x71   : > { %vm393_vm4 = vcmp.lt.s32.totalorder %v391_v9, 300  ;;  %vm394_vm5 = vcmp.lt.s32.totalorder %v392_v10, 300 }
  0x72   : > { %v311_v26 = vadd.f32 %v310_v22, %v309_v18  ;;  %v318_v27 = vadd.f32 %v317_v23, %v316_v19  ;;  %v327_v28 = vadd.f32 %v326_v24, %v325_v20  ;;  %v334_v29 = vadd.f32 %v333_v25, %v332_v21  ;;  %p656_p11 = pnand %p655_p1, %p649_p8 }
  0x74   : > { %v312_v30 = vrot.slane %v311_v26, 2  ;;  %v319_v31 = vrot.slane %v318_v27, 2  ;;  %v328_v32 = vrot.slane %v327_v28, 2  ;;  %v335_v33 = vrot.slane %v334_v29, 2 }
  0x76   : > { %v313_v34 = vadd.f32 %v312_v30, %v311_v26  ;;  %v320_v35 = vadd.f32 %v319_v31, %v318_v27  ;;  %v329_v36 = vadd.f32 %v328_v32, %v327_v28  ;;  %v336_v37 = vadd.f32 %v335_v33, %v334_v29 }
  0x78   : > { %v314_v40 = vrot.slane %v313_v34, 1  ;;  %v321_v41 = vrot.slane %v320_v35, 1  ;;  %v330_v42 = vrot.slane %v329_v36, 1  ;;  %v337_v43 = vrot.slane %v336_v37, 1 }
  0x7a   : > { %v315_v44 = vadd.f32 %v314_v40, %v313_v34  ;;  %v322_v45 = vadd.f32 %v321_v41, %v320_v35  ;;  %v331_v46 = vadd.f32 %v330_v42, %v329_v36  ;;  %v338_v47 = vadd.f32 %v337_v43, %v336_v37 }
  0x7c   : > { %v341_v48 = vsub.f32 1.0, %v315_v44  ;;  %v342_v49 = vsub.f32 1.0, %v322_v45  ;;  %v368_v53 = vcombine.low %v331_v46, %v338_v47 }
  0x7e   : > { %v343_v51 = vmax.f32 %v341_v48, 0.0  ;;  %v344_v52 = vmax.f32 %v342_v49, 0.0  ;;  %v375_v59 = vrot.slane %v368_v53, %v355_v56 }
  0x80   : > { %v345_v54 = vmul.f32 %v343_v51, %v343_v51  ;;  %v346_v55 = vmul.f32 %v344_v52, %v344_v52  ;;  %v382_v6 = vrot.slane %v375_v59, %v355_v56 }
  0x82   : > { %v349_v58 = vcombine.low %v345_v54, %v346_v55 }
  0x84   : > { %v356_v60 = vrot.slane %v349_v58, %v355_v56 }
  0x86   : > { %v363_v5 = vrot.slane %v356_v60, %v355_v56 }
  0x88   : > { %v365_v8 = vmul.f32 %v363_v5, %v340_v62 }
  0x8a   : > { %v384_v11 = vmul.f32 %v382_v6, %v365_v8 }
  0x8c   : > { %v385_v0 = vsub.f32 0.0, %v384_v11 }
  0x8e   : > { %v399_v4 = vrot.slane %v385_v0, %v294_v2  ;;  %v403_v12 = vrot.slane %v385_v0, %v298_v3 }
  0x90   : > { %v406_v13 = vsel %vm393_vm4, %v399_v4, 0.0  ;;  %v407_v14 = vsel %vm394_vm5, %v403_v12, 0.0 }
  0x91   : > { %v408_v15 = vadd.f32 %v407_v14, %v406_v13 }
  0x93   : > { %409 = vst [vmem:[%s261_s7] sm:$0x1] %v408_v15 }
  0x94   : > { %659 = shalt.err (!%p656_p11)
}
  0x95   : > { %s660_s16 = scalar_lea.hbm %s421_s26, 16  ;;  %s664_s11 = scalar_lea.hbm %s945_s3, 32 }
  0x96   : > { %p661_p6 = scmp.ne.s32.totalorder %s421_s26, %s660_s16  ;;  %p665_p13 = scmp.lt.s32.totalorder %s421_s26, %s945_s3 }
  0x97   : > { %p666_p2 = scmp.lt.s32.totalorder %s664_s11, %s660_s16 }
  0x98   : > { %p662_p9 = pnand %p661_p6, %p954_p4 }
  0x99   : > { %p667_p5 = por %p666_p2, %p665_p13 }
  0x9a   : > { %p663_p10 = pneg %p662_p9 }
  0x9c   : > { %p668_p3 = pnand %p667_p5, %p663_p10 }
  0x9e   : > { %671 = shalt.err (!%p668_p3)
}
  0x9f   : > { %552 = dma.vmem_to_hbm [thread:$0]  (%p954_p4), %s424_s8, 16, %s421_s26, %s411_s30  }
  0xa0 PF: > { %s435_s6 = sand.u32 1, %s702_s12   ;;  %p955_p7 = scmp.ne.s32.totalorder %s952_s25, 0 }
  0xa1   : > { %p956_p8 = scmp.ge.s32.totalorder %s714_s15, 2  ;;  %s436_s23 = scalar_lea.sflag [#allocation4], %s435_s6 }
  0xa3   : > { %p555_p12 = pnand %p956_p8, %p955_p7 }
  0xa5   : > { %p556_p0 = pneg %p555_p12 }
  0xa7   : > { %697 = dma.done.wait (%p556_p0), %s436_s23, 16  }
  0xa8   : > { %699 = vsyncadd (%p556_p0), %s436_s23, 4294967280  ;;  %p19_p1 = scmp.ge.s32.totalorder %s767_s18, 4   ;;  %s957_s12 = smov %s706_s13 }
  0xa9   : > { %s958_s13 = smov %s710_s14  ;;  %s959_s14 = smov %s779_s21 }
  0xaa   : > { %s960_s15 = smov %s767_s18  ;;  %21 = sbr.rel (!%p19_p1) target bundleno = 7 (0x7), region = 93 }
  0xaf   :  { %440 = vsyncpa [#allocation3], 1 }
  0xb0   :  { %442 = vsyncpa [#allocation3 + $0x1], 1 }
  0xb1   :  { %443 = vsyncpa [#allocation6], 1 }
  0xb2   :  { %445 = vsyncpa [#allocation6 + $0x1], 1 }
  0xb3   :  { %446 = vsyncpa [#allocation4], 1 }
  0xb4   :  { %448 = vsyncpa [#allocation4 + $0x1], 1 }

</bundles_post_ra>
